<compile_context>
chip_gen: v7x
topology: tpu7x:2x2x1
jax: 0.10.0
libtpu: 0.0.40
codegen_flags: <defaults>
</compile_context>

<pallas_src>
import functools

import jax
import jax.numpy as jnp
from jax.experimental import pallas as pl
from jax.experimental.pallas import tpu as pltpu


def _round_up(x, m):
    return ((x + m - 1) // m) * m


# ---------------------------------------------------------------------------
# Kernel: y_tile = activation(sum_k x_tile @ w_tile + b_tile)
# x_tile: (tm, tk) bf16, w_tile: (tk, tn) bf16 (K-major weight),
# b_tile: (1, tn) f32, o_tile: (tm, tn) f32 (doubles as the accumulator).
# ---------------------------------------------------------------------------
def _linear_act_kernel(x_ref, w_ref, b_ref, o_ref, *, activation):
    k = pl.program_id(2)

    @pl.when(k == 0)
    def _():
        o_ref[...] = jnp.zeros_like(o_ref)

    # bf16 x bf16 -> f32 on the MXU; contraction is (lhs dim 1, rhs dim 0),
    # so no weight transpose is materialized in the kernel.
    o_ref[...] += jnp.dot(x_ref[...], w_ref[...],
                          preferred_element_type=jnp.float32)

    @pl.when(k == pl.num_programs(2) - 1)
    def _():
        z = o_ref[...] + b_ref[...]                       # (tm, tn) + (1, tn)
        if activation == "relu":
            z = jnp.maximum(z, 0.0)
        elif activation == "sigmoid":
            z = 1.0 / (1.0 + jnp.exp(-z))                 # exp -> EUP slot
        o_ref[...] = z


# ---------------------------------------------------------------------------
# Tile selection for the streamed weight (depends only on the layer shape).
# ---------------------------------------------------------------------------
def _choose_weight_tiles(out_features, in_features):
    tn = min(_round_up(out_features, 128), 2048)
    tk = min(_round_up(in_features, 128), 2048)
    # Cap the bf16 weight tile at ~2 MiB (1M elems): double-buffered that is
    # ~4 MiB, comfortably inside the scoped-VMEM defaults of v5e/v6e/v7x.
    while tn * tk > (1 << 20) and tk > 512:
        tk //= 2
    while tn * tk > (1 << 20) and tn > 128:
        tn //= 2
    # Megacore (v7x): batch is tiny for this model, so make sure the parallel
    # O axis has >= 2 programs; otherwise one TensorCore idles on the encoder.
    if _round_up(out_features, tn) // tn < 2 and tn > 128:
        tn //= 2
    return tn, tk


# ---------------------------------------------------------------------------
# One-time parameter prep: pad to tile multiples, transpose to K-major,
# cast weights to bf16 (streamed), keep bias in f32 (tiny).
# ---------------------------------------------------------------------------
def prepare_linear_params(w, b):
    out_features, in_features = w.shape
    assert b.shape == (out_features,)
    tn, tk = _choose_weight_tiles(out_features, in_features)
    op = _round_up(out_features, tn)
    kp = _round_up(in_features, tk)
    w_t = jnp.pad(w, ((0, op - out_features), (0, kp - in_features)))
    w_t = jnp.asarray(w_t.T, dtype=jnp.bfloat16)                  # (Kp, Op)
    b_p = jnp.pad(b, (0, op - out_features)).reshape(1, op).astype(jnp.float32)
    return dict(w_t=w_t, b=b_p, out_features=out_features,
                in_features=in_features, tn=tn, tk=tk)


def prepare_ae_params(w1, b1, w2, b2):
    return dict(encoder=prepare_linear_params(w1, b1),
                decoder=prepare_linear_params(w2, b2))


# ---------------------------------------------------------------------------
# y = activation(x @ W^T + b) using the prepared (padded, K-major, bf16) W.
# ---------------------------------------------------------------------------
def linear_act(x, params, activation):
    n, k_in = x.shape
    assert k_in == params["in_features"]
    tn, tk = params["tn"], params["tk"]
    out_features = params["out_features"]
    kp, op = params["w_t"].shape

    tm = _round_up(min(n, 256), 16)      # >=16 rows: fill bf16 (16,128) vregs
    np_ = _round_up(n, tm)

    # Only the (small) activation is padded/cast per call.
    x_p = jnp.pad(x, ((0, np_ - n), (0, kp - k_in))).astype(jnp.bfloat16)

    grid = (np_ // tm, op // tn, kp // tk)

    out = pl.pallas_call(
        functools.partial(_linear_act_kernel, activation=activation),
        out_shape=jax.ShapeDtypeStruct((np_, op), jnp.float32),
        grid_spec=pltpu.PrefetchScalarGridSpec(
            num_scalar_prefetch=0,
            grid=grid,
            in_specs=[
                pl.BlockSpec((tm, tk), lambda i, j, k: (i, k)),   # x tile
                pl.BlockSpec((tk, tn), lambda i, j, k: (k, j)),   # weight tile
                pl.BlockSpec((1, tn), lambda i, j, k: (0, j)),    # bias tile
            ],
            out_specs=pl.BlockSpec((tm, tn), lambda i, j, k: (i, j)),
        ),
        compiler_params=pltpu.CompilerParams(
            dimension_semantics=("parallel", "parallel", "arbitrary")),
        cost_estimate=pl.CostEstimate(
            flops=2 * np_ * op * kp,
            transcendentals=np_ * op if activation == "sigmoid" else 0,
            bytes_accessed=2 * (np_ * kp + kp * op) + 4 * (op + np_ * op)),
    )(x_p, params["w_t"], params["b"])
    return out[:n, :out_features]


def ae_forward(x, ae_params):
    encoded = linear_act(x, ae_params["encoder"], "relu")       # encoder
    decoded = linear_act(encoded, ae_params["decoder"], "sigmoid")  # decoder
    return decoded


def ae_forward_ref(x, w1, b1, w2, b2):
    h = jnp.maximum(x @ w1.T + b1, 0.0)
    return jax.nn.sigmoid(h @ w2.T + b2)


if __name__ == "__main__":
    # Small shapes consistent with the module structure (real AE is
    # Linear(20531, 256) / Linear(256, 20531); input dim scaled down here,
    # hidden kept at 256 as in the module).
    N, D, H = 8, 512, 256

    key = jax.random.PRNGKey(0)
    kx, k1, k2, k3, k4 = jax.random.split(key, 5)
    x = jax.random.normal(kx, (N, D), dtype=jnp.float32)
    w1 = jax.random.normal(k1, (H, D), dtype=jnp.float32) * 0.05
    b1 = jax.random.normal(k2, (H,), dtype=jnp.float32) * 0.05
    w2 = jax.random.normal(k3, (D, H), dtype=jnp.float32) * 0.05
    b2 = jax.random.normal(k4, (D,), dtype=jnp.float32) * 0.05

    # One-time weight prep (pad + K-major transpose + bf16 cast), then forward.
    params = prepare_ae_params(w1, b1, w2, b2)
    out = ae_forward(x, params)
    out = jax.block_until_ready(out)

    ref = ae_forward_ref(x, w1, b1, w2, b2)
    assert out.shape == (N, D)
    # bf16 operands (f32 MXU accumulation) -> small drift vs pure-f32 reference.
    assert jnp.allclose(out, ref, atol=2e-2, rtol=2e-2), "mismatch vs JAX reference"

    print("KERNEL_OK")
</pallas_src>

<mosaic_0001>
module attributes {stable_mosaic.version = 11 : i64} {
  func.func @_linear_act_kernel(%arg0: i32, %arg1: i32, %arg2: i32, %arg3: memref<16x512xbf16, #tpu.memory_space<vmem>>, %arg4: memref<512x128xbf16, #tpu.memory_space<vmem>>, %arg5: memref<1x128xf32, #tpu.memory_space<vmem>>, %arg6: memref<16x128xf32, #tpu.memory_space<vmem>>) attributes {dimension_semantics = [#tpu.dimension_semantics<parallel>, #tpu.dimension_semantics<parallel>, #tpu.dimension_semantics<arbitrary>], iteration_bounds = array<i64: 1, 2, 1>, scalar_prefetch = 0 : i64, scratch_operands = 0 : i64, tpu.core_type = #tpu.core_type<tc>, window_params = [{transform_indices = @transform_0, window_bounds = array<i64: 16, 512>}, {transform_indices = @transform_1, window_bounds = array<i64: 512, 128>}, {transform_indices = @transform_2, window_bounds = array<i64: 1, 128>}, {transform_indices = @transform_3, window_bounds = array<i64: 16, 128>}]} {
    %c0_i32 = arith.constant 0 : i32
    %0 = arith.cmpi eq, %arg2, %c0_i32 : i32
    %1 = arith.extui %0 : i1 to i32
    %c0_i32_0 = arith.constant 0 : i32
    %2 = arith.cmpi ne, %1, %c0_i32_0 : i32
    scf.if %2 {
      %cst_10 = arith.constant 0.000000e+00 : f32
      %12 = vector.broadcast %cst_10 : f32 to vector<16x128xf32>
      %c0_11 = arith.constant 0 : index
      %c0_12 = arith.constant 0 : index
      %13 = vector.load %arg6[%c0_11, %c0_12] : memref<16x128xf32, #tpu.memory_space<vmem>>, vector<16x128xf32>
      tpu.vector_store %arg6[%c0_11, %c0_12], %12 {strides = array<i32>} : memref<16x128xf32, #tpu.memory_space<vmem>>, vector<16x128xf32>,
    } else {
    }
    %c0 = arith.constant 0 : index
    %c0_1 = arith.constant 0 : index
    %3 = vector.load %arg6[%c0, %c0_1] : memref<16x128xf32, #tpu.memory_space<vmem>>, vector<16x128xf32>
    %c0_2 = arith.constant 0 : index
    %c0_3 = arith.constant 0 : index
    %4 = vector.load %arg3[%c0_2, %c0_3] : memref<16x512xbf16, #tpu.memory_space<vmem>>, vector<16x512xbf16>
    %c0_4 = arith.constant 0 : index
    %c0_5 = arith.constant 0 : index
    %5 = vector.load %arg4[%c0_4, %c0_5] : memref<512x128xbf16, #tpu.memory_space<vmem>>, vector<512x128xbf16>
    %cst = arith.constant dense<0.000000e+00> : vector<16x128xf32>
    %6 = tpu.matmul %4, %5, %cst {dimension_numbers = #tpu.dot_dimension_numbers<[1], [0], [0], [1], [0, 0, 1, 1], [], []>} : vector<16x512xbf16>, vector<512x128xbf16>, vector<16x128xf32> -> vector<16x128xf32>
    %7 = arith.addf %3, %6 : vector<16x128xf32>
    %c0_6 = arith.constant 0 : index
    %c0_7 = arith.constant 0 : index
    %8 = vector.load %arg6[%c0_6, %c0_7] : memref<16x128xf32, #tpu.memory_space<vmem>>, vector<16x128xf32>
    tpu.vector_store %arg6[%c0_6, %c0_7], %7 {strides = array<i32>} : memref<16x128xf32, #tpu.memory_space<vmem>>, vector<16x128xf32>,
    %c0_i32_8 = arith.constant 0 : i32
    %9 = arith.cmpi eq, %arg2, %c0_i32_8 : i32
    %10 = arith.extui %9 : i1 to i32
    %c0_i32_9 = arith.constant 0 : i32
    %11 = arith.cmpi ne, %10, %c0_i32_9 : i32
    scf.if %11 {
      %c0_10 = arith.constant 0 : index
      %c0_11 = arith.constant 0 : index
      %12 = vector.load %arg6[%c0_10, %c0_11] : memref<16x128xf32, #tpu.memory_space<vmem>>, vector<16x128xf32>
      %c0_12 = arith.constant 0 : index
      %c0_13 = arith.constant 0 : index
      %13 = vector.load %arg5[%c0_12, %c0_13] : memref<1x128xf32, #tpu.memory_space<vmem>>, vector<1x128xf32>
      %14 = vector.broadcast %13 : vector<1x128xf32> to vector<16x128xf32>
      %15 = arith.addf %12, %14 : vector<16x128xf32>
      %cst_14 = arith.constant 0.000000e+00 : f32
      %16 = vector.broadcast %cst_14 : f32 to vector<16x128xf32>
      %17 = arith.maximumf %15, %16 : vector<16x128xf32>
      %c0_15 = arith.constant 0 : index
      %c0_16 = arith.constant 0 : index
      %18 = vector.load %arg6[%c0_15, %c0_16] : memref<16x128xf32, #tpu.memory_space<vmem>>, vector<16x128xf32>
      tpu.vector_store %arg6[%c0_15, %c0_16], %17 {strides = array<i32>} : memref<16x128xf32, #tpu.memory_space<vmem>>, vector<16x128xf32>,
    } else {
    }
    return
  }
  func.func @transform_0(%arg0: i32, %arg1: i32, %arg2: i32) -> (i32, i32) {
    %c0_i32 = arith.constant 0 : i32
    return %arg0, %arg2 : i32, i32
  }
  func.func @transform_1(%arg0: i32, %arg1: i32, %arg2: i32) -> (i32, i32) {
    %c0_i32 = arith.constant 0 : i32
    return %arg2, %arg1 : i32, i32
  }
  func.func @transform_2(%arg0: i32, %arg1: i32, %arg2: i32) -> (i32, i32) {
    %c0_i32 = arith.constant 0 : i32
    %c0_i32_0 = arith.constant 0 : i32
    return %c0_i32, %arg1 : i32, i32
  }
  func.func @transform_3(%arg0: i32, %arg1: i32, %arg2: i32) -> (i32, i32) {
    %c0_i32 = arith.constant 0 : i32
    return %arg0, %arg1 : i32, i32
  }
}

</mosaic_0001>

<bundles_post_ra>
// kernel: tpu_custom_call.1
= control target key start
LH: loop header
LB: loop body
LE: loop exit
PB: predicated region body
PF: predicated region fallthrough
CT: control target
= control target key end

     0   :  { %8 = vsyncpa [#allocation3], 0  ;;  %s1436_s0 = inlined_call_operand.hbm [shape: bf16[16,512], index: 0, kind: input, shape index: {}]   ;;  %s1437_s1 = inlined_call_operand.hbm [shape: bf16[512,256], index: 1, kind: input, shape index: {}]   ;;  %s1438_s2 = inlined_call_operand.vmem [shape: f32[1,256], index: 2, kind: input, shape index: {}]   ;;  %s1439_s3 = inlined_call_operand.hbm [shape: f32[16,256], index: 3, kind: output, shape index: {}]  }
   0x1   :  { %9 = vsyncpa [#allocation6], 0 }
   0x2   :  { %11 = vsyncpa [#allocation6 + $0x1], 0 }
   0x3   :  { %12 = vsyncpa [#allocation4], 0 }
   0x4   :  { %14 = vsyncpa [#allocation4 + $0x1], 0  ;;  %s1176_s12 = smov 0   ;;  %s1178_s13 = smov 0  }
   0x5   :  { %s1180_s14 = smov 0   ;;  %s1182_s15 = smov 0  }
   0x6   :  { %s1184_s16 = smov 0   ;;  %s1186_s17 = smov 0  }
   0x7 LB: > { %s783_s18 = sadd.s32 4294967295, %s1143_s17   ;;  %s784_s19 = sadd.s32 4294967294, %s1143_s17   ;;  %s1143_s17 = sphi %s1186_s17, %s20_s17   ;;  %s1139_s16 = sphi %s1184_s16, %s1465_s16   ;;  %s1135_s15 = sphi %s1182_s15, %s1464_s15   ;;  %s1131_s14 = sphi %s1180_s14, %s1463_s14   ;;  %s1127_s13 = sphi %s1178_s13, %s1462_s13   ;;  %s1123_s12 = sphi %s1176_s12, %s1461_s12  }
   0x8   : > { %p83_p0 = scmp.ne.s32.totalorder %s1131_s14, %s1127_s13  ;;  %p84_p1 = scmp.eq.s32.totalorder %s1143_s17, 0 }
   0x9   : > { %p89_p2 = scmp.ne.s32.totalorder %s1127_s13, %s1123_s12  ;;  %p1213_p3 = scmp.eq.s32.totalorder %s783_s18, 0 }
   0xa   : > { %p1217_p4 = por %p84_p1, %p83_p0  ;;  %p141_p5 = scmp.eq.s32.totalorder %s783_s18, 1 }
   0xb   : > { %s1446_s20 = scalar_select %p1213_p3, 1, 0 }
   0xc   : > { %p1223_p6 = por %p1213_p3, %p89_p2  ;;  %p147_p7 = scmp.eq.s32.totalorder %s784_s19, 1 }
   0xd   : > { %p1227_p8 = por %p141_p5, %p83_p0  ;;  %p785_p9 = scmp.ge.s32.totalorder %s1143_s17, 1 }
   0xe   : > { %s1448_s22 = scalar_select %p1223_p6, 1, 0 }
   0xf   : > { %s1449_s23 = scalar_select %p1227_p8, 1, 0 }
  0x10   : > { %p1232_p10 = por %p147_p7, %p89_p2  ;;  %p154_p11 = scmp.lt.s32.totalorder %s1143_s17, 3 }
  0x11   : > { %s1145_s26 = smov [#allocation2]   ;;  %p900_p1 = scmp.lt.s32.totalorder %s1143_s17, 2 }
  0x12   : > { %s1450_s24 = scalar_select %p1232_p10, 1, 0 }
  0x13   : > { %p1237_p12 = pnand %p785_p9, %p154_p11  ;;  %s172_s27 = sshll.u32 %s1145_s26, 4  ;;  %s1241_s27 = int_to_ptr.vmem [resolvable:$true] %s172_s27 }
  0x14   : > { %p1255_p2 = pnand %p900_p1, %p1217_p4  ;;  %s35_s30 = sadd.s32 1, %s1139_s16 }
  0x15   : > { %s1451_s25 = scalar_select %p1237_p12, 1, 0 }
  0x16   : > { %p887_p13 = pneg %p1237_p12  ;;  %s999_s6 = scalar_lea.hbm %s1436_s0, 512 }
  0x17   : > { %s1453_s29 = scalar_select %p1255_p2, 1, 0 }
  0x18   : > { %p1249_p5 = pnand %p887_p13, %p1213_p3  ;;  %p1000_p7 = scmp.ne.s32.totalorder %s1436_s0, %s999_s6 }
  0x19   : > { %p1006_p4 = scmp.lt.u32.totalorder %s999_s6, %s1436_s0 }
  0x1a   : > { %p1001_p9 = pneg %p1249_p5 }
  0x1c   : > { %p1002_p11 = pnand %p1001_p9, %p1000_p7 }
  0x1e   : > { %p1003_p13 = pneg %p1002_p11 }
  0x20   : > { %p1008_p1 = pnand %p1006_p4, %p1003_p13 }
  0x22   : > { %1011 = shalt.err (!%p1008_p1)
}
  0x23   : > { %s1012_s11 = scalar_lea.vmem %s1241_s27, 512  ;;  %p1020_p6 = scmp.lt.s32.totalorder %s1241_s27, %s1241_s27 }
  0x24   : > { %p1013_p0 = scmp.ne.s32.totalorder %s1241_s27, %s1012_s11  ;;  %p1021_p3 = scmp.lt.s32.totalorder %s1012_s11, %s1012_s11 }
  0x26   : > { %p1015_p10 = pnand %p1013_p0, %p1001_p9  ;;  %p1022_p12 = por %p1021_p3, %p1020_p6 }
  0x28   : > { %p1016_p8 = pneg %p1015_p10 }
  0x2a   : > { %p1023_p2 = pnand %p1022_p12, %p1016_p8 }
  0x2c   : > { %1026 = shalt.err (!%p1023_p2)
}
  0x2d   : > { %s1146_s18 = smov 256   ;;  %s1147_s19 = smov 16  }
  0x2e   : > { %890 = dma.hbm_to_vmem [thread:$0]  (!%p1249_p5), %s1436_s0, 512, %s1241_s27, [#allocation3], %s1146_s18, %s1146_s18, %s1147_s19  }
  0x2f   : > { %p37_p10 = scmp.ge.s32.totalorder %s35_s30, 2  ;;  %s76_s4 = sadd.s32 1, %s1131_s14 }
  0x30   : > { %s186_s5 = sand.u32 1, %s1131_s14   ;;  %s789_s8 = sshll.u32 %s1139_s16, 6 }
  0x31   : > { %s1467_s30 = smov (%p37_p10, %s35_s30), 0  ;;  %s788_s6 = sshll.u32 %s186_s5, 8 }
  0x32   : > { %s72_s7 = ssub.s32 %s1139_s16, %s1467_s30  ;;  %s1291_s28 = scalar_lea.hbm %s1437_s1, %s789_s8 }
  0x33   : > { %p74_p3 = scmp.eq.s32.totalorder %s72_s7, 0  ;;  %s190_s27 = scalar_lea.vmem [#allocation5], %s788_s6 }
  0x34   : > { %s199_s11 = sshll.u32 %s190_s27, 4  ;;  %s1298_s19 = scalar_lea.sflag [#allocation6], %s186_s5  ;;  %s1296_s11 = int_to_ptr.vmem [resolvable:$true] %s199_s11 }
  0x35   : > { %s1294_s18 = scalar_select %p74_p3, %s1131_s14, %s76_s4  }
  0x36   : > { %s1027_s21 = scalar_lea.hbm %s1291_s28, 4096  ;;  %p1454_p8 = scmp.ne.s32.totalorder %s1453_s29, 0 }
  0x37   : > { %p1028_p6 = scmp.ne.s32.totalorder %s1291_s28, %s1027_s21  ;;  %s1032_s8 = scalar_lea.hbm %s1437_s1, 8192 }
  0x38   : > { %p1029_p12 = pneg %p1454_p8  ;;  %p1033_p2 = scmp.lt.u32.totalorder %s1291_s28, %s1437_s1 }
  0x39   : > { %p1034_p7 = scmp.lt.u32.totalorder %s1032_s8, %s1027_s21  ;;  %p1036_p11 = scmp.lt.u32.totalorder %s1027_s21, %s1291_s28 }
  0x3a   : > { %p1030_p0 = pnand %p1029_p12, %p1028_p6 }
  0x3b   : > { %p1035_p9 = por %p1034_p7, %p1033_p2 }
  0x3c   : > { %p1031_p5 = pneg %p1030_p0 }
  0x3d   : > { %p1037_p13 = por %p1036_p11, %p1035_p9 }
  0x3f   : > { %p1038_p4 = pnand %p1037_p13, %p1031_p5 }
  0x41   : > { %1041 = shalt.err (!%p1038_p4)
}
  0x42   : > { %s1042_s4 = scalar_lea.vmem %s1296_s11, 4096  ;;  %s1148_s5 = smov [#allocation5]  }
  0x43   : > { %p1043_p1 = scmp.ne.s32.totalorder %s1296_s11, %s1042_s4  ;;  %s1047_s10 = sshll.u32 %s1148_s5, 4  ;;  %s1048_s10 = int_to_ptr.vmem [resolvable:$false] %s1047_s10 }
  0x44   : > { %s1049_s27 = scalar_lea.vmem %s1048_s10, 8192  ;;  %p1050_p6 = scmp.lt.s32.totalorder %s1296_s11, %s1048_s10 }
  0x45   : > { %p1045_p10 = pnand %p1043_p1, %p1029_p12  ;;  %p1051_p0 = scmp.lt.s32.totalorder %s1049_s27, %s1042_s4 }
  0x47   : > { %p1046_p3 = pneg %p1045_p10  ;;  %p1052_p2 = por %p1051_p0, %p1050_p6 }
  0x49   : > { %p1053_p7 = pnand %p1052_p2, %p1046_p3 }
  0x4b   : > { %1056 = shalt.err (!%p1053_p7)
}
  0x4c   : > { %s1149_s21 = smov 128   ;;  %s1150_s26 = smov 64  }
  0x4d   : > { %s1151_s7 = smov 4   ;;  %p1455_p12 = scmp.ne.s32.totalorder %s1451_s25, 0 }
  0x4e   : > { %894 = dma.hbm_to_vmem [thread:$0]  (!%p1454_p8), %s1291_s28, 4096, %s1296_s11, %s1298_s19, %s1149_s21, %s1150_s26, %s1151_s7  }
  0x4f   : > { %217 = sbr.rel (%p1455_p12) target bundleno = 365 (0x16d), region = 32  ;;  %p1456_p5 = scmp.ne.s32.totalorder (!%p1455_p12), %s1446_s20, 0 }
  0x56   : > { %1110 = dma.done.wait (%p1456_p5), [#allocation3], 512  }
  0x57   : > { %1112 = vsyncadd (%p1456_p5), [#allocation3], 4294966784  ;;  %s1333_s8 = sand.u32 1, %s1127_s13   ;;  %p1457_p8 = scmp.ne.s32.totalorder %s1448_s22, 0 }
  0x58   : > { %s792_s6 = sshll.u32 %s1333_s8, 8  ;;  %s224_s9 = scalar_lea.sflag [#allocation6], %s1333_s8 }
  0x59   : > { %s1337_s4 = scalar_lea.vmem [#allocation5], %s792_s6 }
  0x5a   : > { %1114 = dma.done.wait (%p1457_p8), %s224_s9, 4096  }
  0x5b   : > { %1116 = vsyncadd (%p1457_p8), %s224_s9, 4294963200  ;;  %v961_v0 = vld [vmem:[%s1337_s4 + $0x40] sm:$0xff]   ;;  %v965_v4 = vld [vmem:[%s1337_s4 + $0x48] sm:$0xff]   ;;  %p256_p9 = scmp.lt.s32.totalorder %s1135_s15, 1  ;;  %s793_s22 = sshll.u32 %s1333_s8, 4 }
  0x5c   : > { %v962_v1 = vld [vmem:[%s1337_s4 + $0xc0] sm:$0xff]   ;;  %835 = vmatprep.subr.bf16.mxu0 %v961_v0  ;;  %v966_v5 = vld [vmem:[%s1337_s4 + $0xc8] sm:$0xff]   ;;  %v969_v8 = vld [vmem:[%s1337_s4 + $0x50] sm:$0xff]   ;;  %s832_s11 = sshll.u32 %s1135_s15, 7  ;;  %s252_s19 = scalar_lea.vmem [#allocation7], %s793_s22 }
  0x5d   : > { %v963_v2 = vld [vmem:[%s1337_s4] sm:$0xff]   ;;  %857 = vmatprep.subr.bf16.mxu1 %v962_v1  ;;  %v967_v6 = vld [vmem:[%s1337_s4 + $0x8] sm:$0xff]   ;;  %v970_v9 = vld [vmem:[%s1337_s4 + $0xd0] sm:$0xff]   ;;  %s257_s20 = scalar_select %p256_p9, %s1135_s15, 1 }
  0x5e   : > { %v964_v3 = vld [vmem:[%s1337_s4 + $0x80] sm:$0xff]   ;;  %836 = vmatpush3.bf16.msra.mxu0 %v963_v2  ;;  %v968_v7 = vld [vmem:[%s1337_s4 + $0x88] sm:$0xff]   ;;  %v971_v10 = vld [vmem:[%s1337_s4 + $0x10] sm:$0xff]   ;;  %s669_s5 = sshll.u32 %s252_s19, 4  ;;  %s1385_s21 = scalar_lea.hbm %s1439_s3, %s832_s11  ;;  %s1387_s5 = int_to_ptr.vmem [resolvable:$true] %s669_s5 }
  0x5f   : > { %858 = vmatpush3.bf16.msra.mxu1 %v964_v3  ;;  %837 = vmatprep.subr.bf16.mxu0 %v965_v4  ;;  %v972_v11 = vld [vmem:[%s1337_s4 + $0x90] sm:$0xff]   ;;  %v973_v12 = vld [vmem:[%s1337_s4 + $0x58] sm:$0xff]   ;;  %v977_v16 = vld [vmem:[%s1337_s4 + $0x60] sm:$0xff]   ;;  %s258_s28 = scalar_lea.vmem %s1438_s2, %s257_s20  ;;  %s654_s26 = scalar_lea.sflag [#allocation4], %s1333_s8 }
  0x60   : > { %859 = vmatprep.subr.bf16.mxu1 %v966_v5  ;;  %v974_v13 = vld [vmem:[%s1337_s4 + $0xd8] sm:$0xff]   ;;  %v978_v17 = vld [vmem:[%s1337_s4 + $0xe0] sm:$0xff]   ;;  %v981_v20 = vld [vmem:[%s1337_s4 + $0x68] sm:$0xff]   ;;  %s1057_s15 = scalar_lea.vmem %s1387_s5, 256  ;;  %p1458_p13 = scmp.ne.s32.totalorder %s1449_s23, 0 }
  0x61   : > { %v975_v14 = vld [vmem:[%s1337_s4 + $0x18] sm:$0xff]   ;;  %v979_v18 = vld [vmem:[%s1337_s4 + $0x20] sm:$0xff]   ;;  %v982_v21 = vld [vmem:[%s1337_s4 + $0xe8] sm:$0xff]   ;;  %p1058_p11 = scmp.ne.s32.totalorder %s1387_s5, %s1057_s15  ;;  %s1152_s7 = smov [#allocation7]  }
  0x62   : > { %838 = vmatpush3.bf16.msra.mxu0 %v967_v6  ;;  %v976_v15 = vld [vmem:[%s1337_s4 + $0x98] sm:$0xff]   ;;  %v980_v19 = vld [vmem:[%s1337_s4 + $0xa0] sm:$0xff]   ;;  %v983_v22 = vld [vmem:[%s1337_s4 + $0x28] sm:$0xff]   ;;  %s1061_s6 = sshll.u32 %s1152_s7, 4  ;;  %s1062_s6 = int_to_ptr.vmem [resolvable:$false] %s1061_s6 }
  0x63   : > { %860 = vmatpush3.bf16.msra.mxu1 %v968_v7  ;;  %839 = vmatprep.subr.bf16.mxu0 %v969_v8  ;;  %v984_v23 = vld [vmem:[%s1337_s4 + $0xa8] sm:$0xff]   ;;  %v985_v24 = vld [vmem:[%s1337_s4 + $0x70] sm:$0xff]   ;;  %v989_v28 = vld [vmem:[%s1337_s4 + $0x78] sm:$0xff]   ;;  %p1059_p4 = pnand %p1058_p11, %p1458_p13  ;;  %s1063_s9 = scalar_lea.vmem %s1062_s6, 512 }
  0x64   : > { %861 = vmatprep.subr.bf16.mxu1 %v970_v9  ;;  %v986_v25 = vld [vmem:[%s1337_s4 + $0xf0] sm:$0xff]   ;;  %v990_v29 = vld [vmem:[%s1337_s4 + $0xf8] sm:$0xff]   ;;  %v830_v49 = vld [vmem:[%s258_s28] ss:$0 sm:$0xff]  ;;  %p1064_p10 = scmp.lt.s32.totalorder %s1387_s5, %s1062_s6  ;;  %p1065_p3 = scmp.lt.s32.totalorder %s1063_s9, %s1057_s15 }
  0x65   : > { %v987_v26 = vld [vmem:[%s1337_s4 + $0x30] sm:$0xff]   ;;  %v991_v30 = vld [vmem:[%s1337_s4 + $0x38] sm:$0xff]   ;;  %p1060_p1 = pneg %p1059_p4 }
  0x66   : > { %840 = vmatpush3.bf16.msra.mxu0 %v971_v10  ;;  %v988_v27 = vld [vmem:[%s1337_s4 + $0xb0] sm:$0xff]   ;;  %v992_v31 = vld [vmem:[%s1337_s4 + $0xb8] sm:$0xff]   ;;  %p1066_p6 = por %p1065_p3, %p1064_p10 }
  0x67   : > { %862 = vmatpush3.bf16.msra.mxu1 %v972_v11  ;;  %841 = vmatprep.subr.bf16.mxu0 %v973_v12  ;;  %v993_v32 = vld [vmem:[#allocation2] ss:$16 sps:$4 sm:$0xff]   ;;  %v995_v33 = vld [vmem:[#allocation2 + $0x4] ss:$16 sps:$4 sm:$0xff]   ;;  %v996_v34 = vld [vmem:[#allocation2 + $0x8] ss:$16 sps:$4 sm:$0xff]  }
  0x68   : > { %863 = vmatprep.subr.bf16.mxu1 %v974_v13  ;;  %v998_v35 = vld [vmem:[#allocation2 + $0xc] ss:$16 sps:$4 sm:$0xff]   ;;  %581 = vmatprep.mubr.bf16.mxu0 %v995_v33  ;;  %p1067_p0 = pnand %p1066_p6, %p1060_p1 }
  0x69   : > { %622 = vmatprep.mubr.bf16.mxu1 %v998_v35 }
  0x6a   : > { %842 = vmatpush3.bf16.msra.mxu0 %v975_v14 }
  0x6b   : > { %864 = vmatpush3.bf16.msra.mxu1 %v976_v15  ;;  %843 = vmatprep.subr.bf16.mxu0 %v977_v16 }
  0x6c   : > { %865 = vmatprep.subr.bf16.mxu1 %v978_v17 }
  0x6e   : > { %844 = vmatpush3.bf16.msra.mxu0 %v979_v18 }
  0x6f   : > { %866 = vmatpush3.bf16.msra.mxu1 %v980_v19  ;;  %845 = vmatprep.subr.bf16.mxu0 %v981_v20 }
  0x70   : > { %867 = vmatprep.subr.bf16.mxu1 %v982_v21 }
  0x72   : > { %846 = vmatpush3.bf16.msra.mxu0 %v983_v22 }
  0x73   : > { %868 = vmatpush3.bf16.msra.mxu1 %v984_v23  ;;  %847 = vmatprep.subr.bf16.mxu0 %v985_v24 }
  0x74   : > { %869 = vmatprep.subr.bf16.mxu1 %v986_v25 }
  0x76   : > { %848 = vmatpush3.bf16.msra.mxu0 %v987_v26 }
  0x77   : > { %870 = vmatpush3.bf16.msra.mxu1 %v988_v27  ;;  %849 = vmatprep.subr.bf16.mxu0 %v989_v28 }
  0x78   : > { %871 = vmatprep.subr.bf16.mxu1 %v990_v29 }
  0x7a   : > { %850 = vmatpush3.bf16.msra.mxu0 %v991_v30 }
  0x7b   : > { %872 = vmatpush3.bf16.msra.mxu1 %v992_v31 }
  0x7d   : > { %582 = vmatmul.mubr.bf16.vlgmr.msra.gmra.mrb[0].mxu0 %v993_v32 }
  0x7e   : > { %623 = vmatmul.mubr.bf16.vlgmr.msra.gmra.mrb[0].mxu1 %v996_v34 }
 0x150   : > { %v851_v36 = vpop.f32.mrb[0].mxu0 }
 0x151   : > { %v873_v37 = vpop.f32.mrb[0].mxu1  ;;  %v852_v38 = vpop.f32.mrb[1].mxu0 }
 0x152   : > { %v853_v39 = vadd.f32 %v852_v38, %v851_v36  ;;  %v874_v40 = vpop.f32.mrb[1].mxu1  ;;  %v854_v41 = vpop.f32.mrb[2].mxu0 }
 0x153   : > { %v875_v42 = vadd.f32 %v874_v40, %v873_v37  ;;  %v876_v43 = vpop.f32.mrb[2].mxu1  ;;  %v855_v44 = vpop.f32.mrb[3].mxu0 }
 0x154   : > { %v856_v45 = vadd.f32 %v855_v44, %v854_v41  ;;  %v877_v46 = vpop.f32.mrb[3].mxu1 }
 0x155   : > { %v625_v47 = vadd.f32 %v875_v42, %v853_v39  ;;  %v878_v48 = vadd.f32 %v877_v46, %v876_v43 }
 0x157   : > { %v628_v50 = vadd.f32 %v878_v48, %v856_v45  ;;  %v647_v51 = vadd.f32 %v830_v49, %v625_v47 }
 0x159   : > { %v649_v52 = vmax.f32 %v647_v51, 0.0  ;;  %v648_v53 = vadd.f32 %v830_v49, %v628_v50 }
 0x15b   : > { %651 = vst [vmem:[%s252_s19] sm:$0xff] %v649_v52  ;;  %v650_v54 = vmax.f32 %v648_v53, 0.0 }
 0x15d   : > { %652 = vst [vmem:[%s252_s19 + $0x8] sm:$0xff] %v650_v54 }
 0x15e   : > { %1070 = shalt.err (!%p1067_p0)
}
 0x15f   : > { %s1071_s4 = scalar_lea.hbm %s1385_s21, 256  ;;  %s1075_s25 = scalar_lea.hbm %s1439_s3, 512 }
 0x160   : > { %p1072_p2 = scmp.ne.s32.totalorder %s1385_s21, %s1071_s4  ;;  %p1076_p5 = scmp.lt.u32.totalorder %s1385_s21, %s1439_s3 }
 0x161   : > { %p1077_p8 = scmp.lt.u32.totalorder %s1075_s25, %s1071_s4  ;;  %p1079_p11 = scmp.lt.u32.totalorder %s1071_s4, %s1385_s21 }
 0x162   : > { %p1073_p7 = pnand %p1072_p2, %p1458_p13 }
 0x163   : > { %p1078_p9 = por %p1077_p8, %p1076_p5 }
 0x164   : > { %p1074_p12 = pneg %p1073_p7 }
 0x165   : > { %p1080_p4 = por %p1079_p11, %p1078_p9 }
 0x167   : > { %p1081_p1 = pnand %p1080_p4, %p1074_p12 }
 0x169   : > { %1084 = shalt.err (!%p1081_p1)
}
 0x16a   : > { %s1153_s11 = smov 128   ;;  %s1154_s19 = smov 256  }
 0x16b   : > { %s1155_s10 = smov 8  }
 0x16c   : > { %885 = dma.vmem_to_hbm [thread:$0]  (%p1458_p13), %s1387_s5, 256, %s1385_s21, %s654_s26, %s1153_s11, %s1154_s19, %s1155_s10  }
 0x16d PF: > { %s684_s27 = sand.u32 1, %s1123_s12   ;;  %p1459_p10 = scmp.ne.s32.totalorder %s1450_s24, 0 }
 0x16e   : > { %p1460_p3 = scmp.ge.s32.totalorder %s1143_s17, 2  ;;  %s685_s15 = scalar_lea.sflag [#allocation4], %s684_s27 }
 0x170   : > { %p896_p6 = pnand %p1460_p3, %p1459_p10 }
 0x172   : > { %1118 = dma.done.wait (!%p896_p6), %s685_s15, 256  }
 0x173   : > { %1120 = vsyncadd (!%p896_p6), %s685_s15, 4294967040  ;;  %s20_s17 = sadd.s32 1, %s1143_s17   ;;  %s1461_s12 = smov %s1127_s13 }
 0x174   : > { %p17_p0 = scmp.ge.s32.totalorder %s20_s17, 4   ;;  %s1462_s13 = smov %s1131_s14 }
 0x175   : > { %s1463_s14 = smov %s1294_s18  ;;  %s1464_s15 = smov %s1139_s16 }
 0x176   : > { %s1465_s16 = smov %s1467_s30  ;;  %19 = sbr.rel (!%p17_p0) target bundleno = 7 (0x7), region = 94 }
 0x17d   :  { %690 = vsyncpa [#allocation3], 1 }
 0x17e   :  { %692 = vsyncpa [#allocation3 + $0x1], 1 }
 0x17f   :  { %693 = vsyncpa [#allocation6], 1 }
 0x180   :  { %695 = vsyncpa [#allocation6 + $0x1], 1 }
 0x181   :  { %696 = vsyncpa [#allocation4], 1 }
 0x182   :  { %698 = vsyncpa [#allocation4 + $0x1], 1 }

</bundles_post_ra>
